<compile_context>
chip_gen: v7x
topology: tpu7x:2x2x1
jax: 0.10.0
libtpu: 0.0.40
codegen_flags: <defaults>
</compile_context>

<pallas_src>
import functools

import jax
import jax.numpy as jnp
from jax import lax
from jax.experimental import pallas as pl
from jax.experimental.pallas import tpu as pltpu


def _sdpa_single_tile_kernel(q_ref, k_ref, v_ref, o_ref, *, inv_scale):
    # Whole Sk resident: direct, exact softmax (no online-softmax machinery).
    s = lax.dot_general(
        q_ref[...], k_ref[...],
        dimension_numbers=(((2,), (2,)), ((0,), (0,))),
        preferred_element_type=jnp.float32,
    )                                                   # (Bt, Sq, Sk) f32
    if inv_scale != 1.0:
        s = s * jnp.float32(inv_scale)                  # f32 scores, matches qk/scale
    m = jnp.max(s, axis=-1, keepdims=True)
    p = jnp.exp(s - m)
    p = p / jnp.sum(p, axis=-1, keepdims=True)          # exact divide == torch.softmax
    # TODO(synk): dropout_p > 0 path (stateful PRNG Bernoulli mask on p) not
    # implemented; the module default dropout_p=0.0 is an identity op.
    o = lax.dot_general(
        p.astype(v_ref.dtype), v_ref[...],
        dimension_numbers=(((2,), (1,)), ((0,), (0,))),
        preferred_element_type=jnp.float32,
    )                                                   # (Bt, Sq, Dv) f32
    o_ref[...] = o.astype(o_ref.dtype)


def _sdpa_flash_kernel(q_ref, k_ref, v_ref, o_ref, m_sc, l_sc, acc_sc, *,
                       inv_scale):
    kv = pl.program_id(1)

    @pl.when(kv == 0)
    def _():
        m_sc[...] = jnp.full_like(m_sc, -jnp.inf)
        l_sc[...] = jnp.zeros_like(l_sc)
        acc_sc[...] = jnp.zeros_like(acc_sc)

    # Batched q @ k^T, contracting the last dims (no K transpose), f32 acc.
    s = lax.dot_general(
        q_ref[...], k_ref[...],
        dimension_numbers=(((2,), (2,)), ((0,), (0,))),
        preferred_element_type=jnp.float32,
    )                                                   # (Bt, Sq, Tk) f32
    if inv_scale != 1.0:
        s = s * jnp.float32(inv_scale)                  # scale once per score, in f32

    # Online (flash-style) numerically-stable softmax, f32 math.
    m_prev = m_sc[...]
    m_new = jnp.maximum(m_prev, jnp.max(s, axis=-1, keepdims=True))
    alpha = jnp.exp(m_prev - m_new)
    p = jnp.exp(s - m_new)
    l_sc[...] = alpha * l_sc[...] + jnp.sum(p, axis=-1, keepdims=True)

    pv = lax.dot_general(
        p.astype(v_ref.dtype), v_ref[...],
        dimension_numbers=(((2,), (1,)), ((0,), (0,))),
        preferred_element_type=jnp.float32,
    )                                                   # (Bt, Sq, Dv) f32
    acc_sc[...] = alpha * acc_sc[...] + pv
    m_sc[...] = m_new

    @pl.when(kv == pl.num_programs(1) - 1)
    def _():
        # Exact division (approx reciprocal previously failed the tolerance).
        o_ref[...] = (acc_sc[...] / l_sc[...]).astype(o_ref.dtype)


def _largest_divisor_leq(n, cap):
    cap = max(1, min(n, cap))
    for cand in range(cap, 0, -1):
        if n % cand == 0:
            return cand
    return 1


def sdpa_pallas(q, k, v, scale_factor=1.0, dropout_p=0.0, *,
                block_b=None, block_k=None):
    assert dropout_p == 0.0, "only dropout_p=0.0 (module default) is implemented"
    B, Sq, D = q.shape
    Bk, Sk, Dk = k.shape
    Bv, Skv, Dv = v.shape
    assert B == Bk == Bv and D == Dk and Sk == Skv

    in_bytes = jnp.dtype(q.dtype).itemsize

    # KV tile along the reduction axis: whole Sk when small, else a divisor <= 512.
    if block_k is None:
        block_k = Sk if Sk <= 512 else _largest_divisor_leq(Sk, 512)
    assert Sk % block_k == 0, "Sk must be divisible by the KV tile size"
    single_tile = (block_k == Sk)

    # Explicit double-buffered VMEM footprint for a candidate batch tile.
    def footprint(bb):
        f = 2 * bb * Sq * D * in_bytes            # Q block (double-buffered)
        f += 2 * bb * block_k * D * in_bytes      # K block
        f += 2 * bb * block_k * Dv * in_bytes     # V block
        f += 2 * bb * Sq * Dv * in_bytes          # out block
        if not single_tile:
            f += bb * Sq * (1 + 1 + Dv) * 4       # m, l, acc f32 scratch
        return f

    if block_b is None:
        budget = 32 * 1024 * 1024                 # safe on v5e/v6e scoped + v7x physical VMEM
        # Keep >= 2 batch grid steps when possible so v7x megacore gets both TCs busy.
        cap = B if B < 2 else max(1, B // 2)
        block_b = 1
        for cand in range(cap, 0, -1):
            if B % cand == 0 and footprint(cand) <= budget:
                block_b = cand
                break
    assert B % block_b == 0

    fp = footprint(block_b)
    vmem_limit = None
    if fp > 12 * 1024 * 1024:
        vmem_limit = min(int(fp * 3 // 2), 60 * 1024 * 1024)

    inv_scale = 1.0 / float(scale_factor)

    itemsize = lambda a: jnp.dtype(a.dtype).itemsize
    cost = pl.CostEstimate(
        flops=2 * B * Sq * Sk * (D + Dv),
        transcendentals=B * Sq * Sk,
        bytes_accessed=(q.size * itemsize(q) + k.size * itemsize(k)
                        + v.size * itemsize(v) + B * Sq * Dv * itemsize(q)),
    )

    out_shape = jax.ShapeDtypeStruct((B, Sq, Dv), q.dtype)

    if single_tile:
        kernel = functools.partial(_sdpa_single_tile_kernel, inv_scale=inv_scale)
        grid_spec = pltpu.PrefetchScalarGridSpec(
            num_scalar_prefetch=0,
            grid=(B // block_b,),
            in_specs=[
                pl.BlockSpec((block_b, Sq, D), lambda b: (b, 0, 0)),
                pl.BlockSpec((block_b, Sk, D), lambda b: (b, 0, 0)),
                pl.BlockSpec((block_b, Sk, Dv), lambda b: (b, 0, 0)),
            ],
            out_specs=pl.BlockSpec((block_b, Sq, Dv), lambda b: (b, 0, 0)),
        )
        dim_sem = ("parallel",)
    else:
        kernel = functools.partial(_sdpa_flash_kernel, inv_scale=inv_scale)
        grid_spec = pltpu.PrefetchScalarGridSpec(
            num_scalar_prefetch=0,
            grid=(B // block_b, Sk // block_k),
            in_specs=[
                pl.BlockSpec((block_b, Sq, D), lambda b, kv: (b, 0, 0)),
                pl.BlockSpec((block_b, block_k, D), lambda b, kv: (b, kv, 0)),
                pl.BlockSpec((block_b, block_k, Dv), lambda b, kv: (b, kv, 0)),
            ],
            out_specs=pl.BlockSpec((block_b, Sq, Dv), lambda b, kv: (b, 0, 0)),
            scratch_shapes=[
                pltpu.VMEM((block_b, Sq, 1), jnp.float32),   # running max m
                pltpu.VMEM((block_b, Sq, 1), jnp.float32),   # running sum l
                pltpu.VMEM((block_b, Sq, Dv), jnp.float32),  # output accumulator
            ],
        )
        dim_sem = ("parallel", "arbitrary")

    return pl.pallas_call(
        kernel,
        out_shape=out_shape,
        grid_spec=grid_spec,
        compiler_params=pltpu.CompilerParams(
            dimension_semantics=dim_sem,
            vmem_limit_bytes=vmem_limit,
        ),
        cost_estimate=cost,
    )(q, k, v)


def sdpa_reference(q, k, v, scale_factor=1.0):
    s = jnp.einsum("bqd,bkd->bqk", q, k) / scale_factor
    p = jax.nn.softmax(s, axis=-1)
    return jnp.einsum("bqk,bkv->bqv", p, v)


if __name__ == "__main__":
    key = jax.random.PRNGKey(0)
    kq, kk, kv_ = jax.random.split(key, 3)

    # Shapes consistent with the module: q:(B,Sq,D), k:(B,Sk,D), v:(B,Sk,Dv).
    B, Sq, Sk, D, Dv = 2, 8, 8, 16, 32
    q = jax.random.normal(kq, (B, Sq, D), dtype=jnp.float32)
    k = jax.random.normal(kk, (B, Sk, D), dtype=jnp.float32)
    v = jax.random.normal(kv_, (B, Sk, Dv), dtype=jnp.float32)

    out = sdpa_pallas(q, k, v, scale_factor=1.0, dropout_p=0.0)
    out = jax.block_until_ready(out)
    ref = sdpa_reference(q, k, v, scale_factor=1.0)
    assert out.shape == (B, Sq, Dv)
    assert jnp.allclose(out, ref, atol=1e-3, rtol=1e-3), float(
        jnp.max(jnp.abs(out - ref)))

    # Also exercise the flash (multi-KV-tile) path with a longer Sk and a
    # non-unit scale factor.
    B2, Sq2, Sk2, D2, Dv2 = 2, 8, 256, 16, 32
    q2 = jax.random.normal(kq, (B2, Sq2, D2), dtype=jnp.float32)
    k2 = jax.random.normal(kk, (B2, Sk2, D2), dtype=jnp.float32)
    v2 = jax.random.normal(kv_, (B2, Sk2, Dv2), dtype=jnp.float32)
    out2 = sdpa_pallas(q2, k2, v2, scale_factor=2.0, dropout_p=0.0, block_k=128)
    out2 = jax.block_until_ready(out2)
    ref2 = sdpa_reference(q2, k2, v2, scale_factor=2.0)
    assert out2.shape == (B2, Sq2, Dv2)
    assert jnp.allclose(out2, ref2, atol=1e-3, rtol=1e-3), float(
        jnp.max(jnp.abs(out2 - ref2)))

    print("KERNEL_OK")
</pallas_src>

<mosaic_0001>
module attributes {stable_mosaic.version = 11 : i64} {
  func.func @_sdpa_single_tile_kernel(%arg0: i32, %arg1: memref<1x8x16xf32, #tpu.memory_space<vmem>>, %arg2: memref<1x8x16xf32, #tpu.memory_space<vmem>>, %arg3: memref<1x8x32xf32, #tpu.memory_space<vmem>>, %arg4: memref<1x8x32xf32, #tpu.memory_space<vmem>>) attributes {dimension_semantics = [#tpu.dimension_semantics<parallel>], iteration_bounds = array<i64: 2>, scalar_prefetch = 0 : i64, scratch_operands = 0 : i64, tpu.core_type = #tpu.core_type<tc>, window_params = [{transform_indices = @transform_0, window_bounds = array<i64: 1, 8, 16>}, {transform_indices = @transform_1, window_bounds = array<i64: 1, 8, 16>}, {transform_indices = @transform_2, window_bounds = array<i64: 1, 8, 32>}, {transform_indices = @transform_3, window_bounds = array<i64: 1, 8, 32>}]} {
    %c0 = arith.constant 0 : index
    %c0_0 = arith.constant 0 : index
    %c0_1 = arith.constant 0 : index
    %0 = vector.load %arg1[%c0, %c0_0, %c0_1] : memref<1x8x16xf32, #tpu.memory_space<vmem>>, vector<1x8x16xf32>
    %c0_2 = arith.constant 0 : index
    %c0_3 = arith.constant 0 : index
    %c0_4 = arith.constant 0 : index
    %1 = vector.load %arg2[%c0_2, %c0_3, %c0_4] : memref<1x8x16xf32, #tpu.memory_space<vmem>>, vector<1x8x16xf32>
    %cst = arith.constant dense<0.000000e+00> : vector<1x8x8xf32>
    %2 = tpu.matmul %0, %1, %cst {dimension_numbers = #tpu.dot_dimension_numbers<[2], [2], [1], [1], [0, 0, 0, 1, 1, 1], [0], [0]>} : vector<1x8x16xf32>, vector<1x8x16xf32>, vector<1x8x8xf32> -> vector<1x8x8xf32>
    %cst_5 = arith.constant dense<0xFF800000> : vector<1x8xf32>
    %3 = vector.multi_reduction <maximumf>, %2, %cst_5 [2] : vector<1x8x8xf32> to vector<1x8xf32>
    %4 = vector.shape_cast %3 : vector<1x8xf32> to vector<1x8x1xf32>
    %5 = vector.broadcast %4 : vector<1x8x1xf32> to vector<1x8x8xf32>
    %6 = arith.subf %2, %5 : vector<1x8x8xf32>
    %7 = math.exp %6 : vector<1x8x8xf32>
    %cst_6 = arith.constant dense<0.000000e+00> : vector<1x8xf32>
    %8 = vector.multi_reduction <add>, %7, %cst_6 [2] : vector<1x8x8xf32> to vector<1x8xf32>
    %9 = vector.shape_cast %8 : vector<1x8xf32> to vector<1x8x1xf32>
    %10 = vector.broadcast %9 : vector<1x8x1xf32> to vector<1x8x8xf32>
    %11 = arith.divf %7, %10 : vector<1x8x8xf32>
    %c0_7 = arith.constant 0 : index
    %c0_8 = arith.constant 0 : index
    %c0_9 = arith.constant 0 : index
    %12 = vector.load %arg3[%c0_7, %c0_8, %c0_9] : memref<1x8x32xf32, #tpu.memory_space<vmem>>, vector<1x8x32xf32>
    %cst_10 = arith.constant dense<0.000000e+00> : vector<1x8x32xf32>
    %13 = tpu.matmul %11, %12, %cst_10 {dimension_numbers = #tpu.dot_dimension_numbers<[2], [1], [1], [2], [0, 0, 0, 1, 1, 2], [0], [0]>} : vector<1x8x8xf32>, vector<1x8x32xf32>, vector<1x8x32xf32> -> vector<1x8x32xf32>
    %c0_11 = arith.constant 0 : index
    %c0_12 = arith.constant 0 : index
    %c0_13 = arith.constant 0 : index
    %14 = vector.load %arg4[%c0_11, %c0_12, %c0_13] : memref<1x8x32xf32, #tpu.memory_space<vmem>>, vector<1x8x32xf32>
    tpu.vector_store %arg4[%c0_11, %c0_12, %c0_13], %13 {strides = array<i32>} : memref<1x8x32xf32, #tpu.memory_space<vmem>>, vector<1x8x32xf32>,
    return
  }
  func.func @transform_0(%arg0: i32) -> (i32, i32, i32) {
    %c0_i32 = arith.constant 0 : i32
    %c0_i32_0 = arith.constant 0 : i32
    %c0_i32_1 = arith.constant 0 : i32
    return %arg0, %c0_i32, %c0_i32_0 : i32, i32, i32
  }
  func.func @transform_1(%arg0: i32) -> (i32, i32, i32) {
    %c0_i32 = arith.constant 0 : i32
    %c0_i32_0 = arith.constant 0 : i32
    %c0_i32_1 = arith.constant 0 : i32
    return %arg0, %c0_i32, %c0_i32_0 : i32, i32, i32
  }
  func.func @transform_2(%arg0: i32) -> (i32, i32, i32) {
    %c0_i32 = arith.constant 0 : i32
    %c0_i32_0 = arith.constant 0 : i32
    %c0_i32_1 = arith.constant 0 : i32
    return %arg0, %c0_i32, %c0_i32_0 : i32, i32, i32
  }
  func.func @transform_3(%arg0: i32) -> (i32, i32, i32) {
    %c0_i32 = arith.constant 0 : i32
    %c0_i32_0 = arith.constant 0 : i32
    %c0_i32_1 = arith.constant 0 : i32
    return %arg0, %c0_i32, %c0_i32_0 : i32, i32, i32
  }
}

</mosaic_0001>

<bundles_post_ra>
// kernel: tpu_custom_call.1
= control target key start
LH: loop header
LB: loop body
LE: loop exit
PB: predicated region body
PF: predicated region fallthrough
CT: control target
= control target key end

     0   :  { %s1074_s0 = inlined_call_operand.hbm [shape: f32[2,8,16], index: 0, kind: input, shape index: {}]   ;;  %s1075_s1 = inlined_call_operand.hbm [shape: f32[2,8,16], index: 1, kind: input, shape index: {}]   ;;  %s1076_s2 = inlined_call_operand.hbm [shape: f32[2,8,32], index: 2, kind: input, shape index: {}]   ;;  %s1077_s3 = inlined_call_operand.hbm [shape: f32[2,8,32], index: 3, kind: output, shape index: {}]  }
   0x1   :  { %1082 = sst [smem:[#allocation12_spill]] %s1075_s1 }
   0x2   :  { %8 = vsyncpa [#allocation3], 0 }
   0x3   :  { %10 = vsyncpa [#allocation3 + $0x1], 0 }
   0x4   :  { %11 = vsyncpa [#allocation6], 0 }
   0x5   :  { %13 = vsyncpa [#allocation6 + $0x1], 0 }
   0x6   :  { %14 = vsyncpa [#allocation4], 0 }
   0x7   :  { %16 = vsyncpa [#allocation4 + $0x1], 0  ;;  %s836_s12 = smov 0   ;;  %s838_s13 = smov 0  }
   0x8   :  { %s840_s14 = smov 0   ;;  %s842_s15 = smov 0  }
   0x9 LB: > { %s857_s16 = sadd.s32 4294967295, %s808_s15   ;;  %s551_s17 = sadd.s32 4294967294, %s808_s15   ;;  %s808_s15 = sphi %s842_s15, %s1101_s15   ;;  %s804_s14 = sphi %s840_s14, %s1100_s14   ;;  %s800_s13 = sphi %s838_s13, %s1099_s13   ;;  %s796_s12 = sphi %s836_s12, %s1098_s12  }
   0xa   : > { %s861_s18 = sadd.s32 1, %s808_s15   ;;  %s29_s19 = sadd.s32 1, %s804_s14 }
   0xb   : > { %s26_s20 = ssub.s32 %s808_s15, %s861_s18  ;;  %p36_p0 = scmp.ne.s32.totalorder %s804_s14, %s800_s13 }
   0xc   : > { %p27_p1 = scmp.eq.s32.totalorder %s26_s20, 0  ;;  %p37_p2 = scmp.eq.s32.totalorder %s808_s15, 0 }
   0xd   : > { %p42_p3 = scmp.ne.s32.totalorder %s800_s13, %s796_s12  ;;  %p43_p4 = scmp.eq.s32.totalorder %s857_s16, 0 }
   0xe   : > { %s873_s21 = scalar_select %p27_p1, %s804_s14, %s29_s19  }
   0xf   : > { %p38_p5 = por %p37_p2, %p36_p0  ;;  %p875_p6 = por %p43_p4, %p42_p3 }
  0x10   : > { %p118_p7 = scmp.eq.s32.totalorder %s857_s16, 1  ;;  %p124_p8 = scmp.eq.s32.totalorder %s551_s17, 1 }
  0x11   : > { %s1083_s22 = scalar_select %p875_p6, 1, 0 }
  0x12   : > { %p608_p10 = scmp.lt.s32.totalorder %s808_s15, 2  ;;  %p882_p11 = por %p118_p7, %p36_p0 }
  0x13   : > { %p886_p12 = por %p124_p8, %p42_p3  ;;  %s144_s25 = sand.u32 1, %s804_s14  }
  0x14   : > { %s1084_s23 = scalar_select %p882_p11, 1, 0 }
  0x15   : > { %s1085_s24 = scalar_select %p886_p12, 1, 0 }
  0x16   : > { %s892_s26 = sshll.u32 %s808_s15, 7  ;;  %s896_s27 = sshll.u32 %s144_s25, 3 }
  0x17   : > { %p898_p13 = pnand %p608_p10, %p38_p5  ;;  %s162_s29 = sand.u32 1, %s808_s15  }
  0x18   : > { %s1087_s1 = sld [smem:[#allocation12_spill]]  ;;  %s166_s6 = scalar_lea.vmem [#allocation5], %s896_s27 }
  0x19   : > { %s1086_s28 = scalar_select %p898_p13, 1, 0 }
  0x1a   : > { %s173_s7 = sshll.u32 %s166_s6, 4  ;;  %s913_s8 = scalar_lea.sflag [#allocation6], %s162_s29  ;;  %s910_s7 = int_to_ptr.vmem [resolvable:$true] %s173_s7 }
  0x1b   : > { %p919_p2 = pneg %p898_p13 }
  0x1e   : > { %s907_s5 = scalar_lea.hbm %s1087_s1, %s892_s26  ;;  %s653_s19 = scalar_lea.hbm %s1087_s1, 256 }
  0x1f   : > { %s648_s9 = scalar_lea.hbm %s907_s5, 128  ;;  %p654_p5 = scmp.lt.u32.totalorder %s907_s5, %s1087_s1 }
  0x20   : > { %p649_p1 = scmp.ne.s32.totalorder %s907_s5, %s648_s9  ;;  %p655_p7 = scmp.lt.u32.totalorder %s653_s19, %s648_s9 }
  0x21   : > { %p657_p10 = scmp.lt.u32.totalorder %s648_s9, %s907_s5 }
  0x22   : > { %p651_p3 = pnand %p919_p2, %p649_p1  ;;  %p656_p8 = por %p655_p7, %p654_p5 }
  0x24   : > { %p652_p4 = pneg %p651_p3  ;;  %p658_p9 = por %p657_p10, %p656_p8 }
  0x26   : > { %p659_p0 = pnand %p658_p9, %p652_p4 }
  0x28   : > { %662 = shalt.err (!%p659_p0)
}
  0x29   : > { %s663_s29 = scalar_lea.vmem %s910_s7, 128  ;;  %s810_s4 = smov [#allocation5]  }
  0x2a   : > { %p664_p1 = scmp.ne.s32.totalorder %s910_s7, %s663_s29  ;;  %s668_s6 = sshll.u32 %s810_s4, 4  ;;  %s669_s6 = int_to_ptr.vmem [resolvable:$false] %s668_s6 }
  0x2b   : > { %s670_s11 = scalar_lea.vmem %s669_s6, 256  ;;  %p671_p11 = scmp.lt.s32.totalorder %s910_s7, %s669_s6 }
  0x2c   : > { %p666_p3 = pnand %p664_p1, %p919_p2  ;;  %p672_p6 = scmp.lt.s32.totalorder %s670_s11, %s663_s29 }
  0x2e   : > { %p667_p12 = pneg %p666_p3  ;;  %p673_p5 = por %p672_p6, %p671_p11 }
  0x30   : > { %p674_p7 = pnand %p673_p5, %p667_p12 }
  0x32   : > { %677 = shalt.err (!%p674_p7)
}
  0x33   : > { %600 = dma.hbm_to_vmem [thread:$0]  (!%p898_p13), %s907_s5, 128, %s910_s7, %s913_s8  }
  0x34   : > { %p196_p9 = scmp.lt.s32.totalorder %s808_s15, 3  ;;  %s948_s19 = scalar_lea.hbm %s1074_s0, %s892_s26 }
  0x35   : > { %p1089_p6 = scmp.ge.s32.totalorder %s808_s15, 1  ;;  %s148_s30 = scalar_lea.vmem [#allocation2], %s896_s27 }
  0x36   : > { %s155_s29 = sshll.u32 %s148_s30, 4  ;;  %s145_s5 = scalar_lea.sflag [#allocation3], %s144_s25  ;;  %s156_s29 = int_to_ptr.vmem [resolvable:$true] %s155_s29 }
  0x37   : > { %p952_p11 = pnand %p1089_p6, %p196_p9  ;;  %s678_s7 = scalar_lea.hbm %s948_s19, 128 }
  0x38   : > { %p679_p12 = scmp.ne.s32.totalorder %s948_s19, %s678_s7  ;;  %s683_s11 = scalar_lea.hbm %s1074_s0, 256 }
  0x39   : > { %s1090_s20 = scalar_select %p952_p11, 1, 0 }
  0x3a   : > { %p681_p0 = pnand %p679_p12, %p919_p2  ;;  %p684_p8 = scmp.lt.u32.totalorder %s948_s19, %s1074_s0 }
  0x3b   : > { %p685_p10 = scmp.lt.u32.totalorder %s683_s11, %s678_s7  ;;  %p687_p3 = scmp.lt.u32.totalorder %s678_s7, %s948_s19 }
  0x3c   : > { %p682_p4 = pneg %p681_p0 }
  0x3d   : > { %p686_p1 = por %p685_p10, %p684_p8 }
  0x3f   : > { %p688_p5 = por %p687_p3, %p686_p1 }
  0x41   : > { %p689_p7 = pnand %p688_p5, %p682_p4 }
  0x43   : > { %692 = shalt.err (!%p689_p7)
}
  0x44   : > { %s693_s25 = scalar_lea.vmem %s156_s29, 128  ;;  %s811_s30 = smov [#allocation2]  }
  0x45   : > { %p694_p9 = scmp.ne.s32.totalorder %s156_s29, %s693_s25  ;;  %s698_s1 = sshll.u32 %s811_s30, 4  ;;  %s699_s1 = int_to_ptr.vmem [resolvable:$false] %s698_s1 }
  0x46   : > { %s700_s4 = scalar_lea.vmem %s699_s1, 256  ;;  %p701_p0 = scmp.lt.s32.totalorder %s156_s29, %s699_s1 }
  0x47   : > { %p696_p6 = pnand %p694_p9, %p919_p2  ;;  %p702_p11 = scmp.lt.s32.totalorder %s700_s4, %s693_s25 }
  0x49   : > { %p697_p12 = pneg %p696_p6  ;;  %p703_p13 = por %p702_p11, %p701_p0 }
  0x4b   : > { %p704_p8 = pnand %p703_p13, %p697_p12 }
  0x4d   : > { %707 = shalt.err (!%p704_p8)
}
  0x4e   : > { %p1091_p10 = scmp.ne.s32.totalorder %s1086_s28, 0  ;;  %s980_s11 = scalar_lea.hbm %s1076_s2, %s892_s26 }
  0x4f   : > { %s184_s1 = scalar_lea.vmem [#allocation7], %s896_s27  ;;  %s708_s17 = scalar_lea.hbm %s980_s11, 128 }
  0x50   : > { %597 = dma.hbm_to_vmem [thread:$0]  (!%p1091_p10), %s948_s19, 128, %s156_s29, %s145_s5  }
  0x51   : > { %s191_s9 = sshll.u32 %s184_s1, 4  ;;  %p709_p13 = scmp.ne.s32.totalorder %s980_s11, %s708_s17  ;;  %s192_s9 = int_to_ptr.vmem [resolvable:$true] %s191_s9 }
  0x52   : > { %s713_s19 = scalar_lea.hbm %s1076_s2, 256  ;;  %p714_p1 = scmp.lt.u32.totalorder %s980_s11, %s1076_s2 }
  0x53   : > { %p711_p11 = pnand %p709_p13, %p919_p2  ;;  %p715_p3 = scmp.lt.u32.totalorder %s713_s19, %s708_s17 }
  0x54   : > { %p717_p7 = scmp.lt.u32.totalorder %s708_s17, %s980_s11 }
  0x55   : > { %p712_p4 = pneg %p711_p11  ;;  %p716_p5 = por %p715_p3, %p714_p1 }
  0x57   : > { %p718_p9 = por %p717_p7, %p716_p5 }
  0x59   : > { %p719_p6 = pnand %p718_p9, %p712_p4 }
  0x5b   : > { %722 = shalt.err (!%p719_p6)
}
  0x5c   : > { %s723_s26 = scalar_lea.vmem %s192_s9, 128  ;;  %s812_s27 = smov [#allocation7]  }
  0x5d   : > { %p724_p12 = scmp.ne.s32.totalorder %s192_s9, %s723_s26  ;;  %s728_s4 = sshll.u32 %s812_s27, 4  ;;  %s729_s4 = int_to_ptr.vmem [resolvable:$false] %s728_s4 }
  0x5e   : > { %s730_s7 = scalar_lea.vmem %s729_s4, 256  ;;  %p731_p13 = scmp.lt.s32.totalorder %s192_s9, %s729_s4 }
  0x5f   : > { %p726_p0 = pnand %p724_p12, %p919_p2  ;;  %p732_p11 = scmp.lt.s32.totalorder %s730_s7, %s723_s26 }
  0x61   : > { %p727_p8 = pneg %p726_p0  ;;  %p733_p10 = por %p732_p11, %p731_p13 }
  0x63   : > { %p734_p1 = pnand %p733_p10, %p727_p8 }
  0x65   : > { %737 = shalt.err (!%p734_p1)
}
  0x66   : > { %p1092_p3 = scmp.ne.s32.totalorder %s1086_s28, 0  ;;  %p1093_p4 = scmp.ne.s32.totalorder %s1090_s20, 0 }
  0x67   : > { %s1004_s10 = sand.u32 (!%p1093_p4), 1, %s800_s13   ;;  %p1094_p2 = scmp.ne.s32.totalorder (!%p1093_p4), %s1083_s22, 0 }
  0x68   : > { %603 = dma.hbm_to_vmem [thread:$0]  (!%p1092_p3), %s980_s11, 128, %s192_s9, %s913_s8  }
  0x69   : > { %200 = sbr.rel (%p1093_p4) target bundleno = 874 (0x36a), region = 32  ;;  %s1007_s6 = sshll.u32 (!%p1093_p4), %s1004_s10, 3 }
  0x6a   : > { %s203_s1 = scalar_lea.sflag (!%p1093_p4), [#allocation3], %s1004_s10  ;;  %s206_s17 = scalar_lea.vmem (!%p1093_p4), [#allocation2], %s1007_s6 }
  0x70   : > { %783 = dma.done.wait (%p1094_p2), %s203_s1, 128  }
  0x71   : > { %785 = vsyncadd (%p1094_p2), %s203_s1, 4294967168  ;;  %s211_s28 = sand.u32 1, %s857_s16   ;;  %s215_s20 = scalar_lea.vmem [#allocation5], %s1007_s6 }
  0x72   : > { %s212_s8 = scalar_lea.sflag [#allocation6], %s211_s28 }
  0x73   : > { %787 = dma.done.wait (%p1094_p2), %s212_s8, 256  }
  0x74   : > { %789 = vsyncadd (%p1094_p2), %s212_s8, 4294967040  ;;  %v813_v0 = vmov 0.0   ;;  %vm814_vm0 = vmmov 0   ;;  %vm259_vm1 = vcmask 130048   ;;  %v258_v1 = vld [vmem:[%s215_s20] sm:$0xff]  ;;  %v257_v2 = vld [vmem:[%s206_s17] sm:$0xff] }
  0x75   : > { %576 = vmatprep.subr.mxu0 %v813_v0  ;;  %578 = vmatprep.mubr.msk.f32.mxu0 %vm814_vm0, %v813_v0  ;;  %vm336_vm2 = vcmask 64512   ;;  %s224_s22 = scalar_lea.vmem [#allocation7], %s1007_s6  ;;  %s569_s11 = sshll.u32 %s857_s16, 7  ;;  %vm422_vm3 = vcmask 261120  }
  0x76   : > { %581 = vmatprep.subr.mxu1 %v813_v0  ;;  %583 = vmatprep.mubr.msk.f32.mxu1 %vm814_vm0, %v813_v0  ;;  %v348_v11 = vld [vmem:[%s224_s22] sm:$0xff]  ;;  %s256_s9 = scalar_lea.vmem [#allocation8], %s1007_s6  ;;  %s1030_s29 = scalar_lea.hbm %s1077_s3, %s569_s11 }
  0x77   : > { %577 = vmatpush3.xpose.msk.msra.mxu0 %vm259_vm1, %v258_v1  ;;  %582 = vmatpush3.msra.mxu1 %v348_v11  ;;  %s438_s25 = sshll.u32 %s256_s9, 4  ;;  %s425_s5 = scalar_lea.sflag [#allocation4], %s1004_s10  ;;  %s1032_s25 = int_to_ptr.vmem [resolvable:$true] %s438_s25 }
  0x78   : > { %s738_s26 = scalar_lea.vmem %s1032_s25, 128  ;;  %p1095_p5 = scmp.ne.s32.totalorder %s1084_s23, 0 }
  0x79   : > { %p739_p10 = scmp.ne.s32.totalorder %s1032_s25, %s738_s26  ;;  %s815_s16 = smov [#allocation8]  }
  0x7a   : > { %579 = vmatmul.mubr.msk.f32.vlgmr.msra.gmra.mrb[0].mxu0 %vm259_vm1, %v257_v2  ;;  %s742_s27 = sshll.u32 %s815_s16, 4  ;;  %s743_s27 = int_to_ptr.vmem [resolvable:$false] %s742_s27 }
  0x7b   : > { %p740_p7 = pnand %p739_p10, %p1095_p5  ;;  %s744_s4 = scalar_lea.vmem %s743_s27, 256 }
  0x7c   : > { %p745_p6 = scmp.lt.s32.totalorder %s1032_s25, %s743_s27  ;;  %p746_p12 = scmp.lt.s32.totalorder %s744_s4, %s738_s26 }
  0x7d   : > { %p741_p9 = pneg %p740_p7 }
  0x7e   : > { %p747_p0 = por %p746_p12, %p745_p6 }
  0x80   : > { %p748_p8 = pnand %p747_p0, %p741_p9 }
 0x14d   : > { %v332_v3 = vpop.f32.mrb[0].mxu0 }
 0x14e   : > { %v580_v4 = vpop.f32.mrb[1].mxu0  ;;  %v337_v5 = vsel %vm336_vm2, %v332_v3, -inf }
 0x14f   : > { %338 = vmax.xlane.f32.xlu0 %v337_v5 }
 0x1dc   : > { %v339_v6 = vpop.xlane.xlu0 %338 }
 0x1dd   : > { %v340_v7 = vsub.f32 %v332_v3, %v339_v6 }
 0x1df   : > { %v341_v8 = vmul.f32 1.442695, %v340_v7 }
 0x1e1   : > { %644 = vpow2.f32 %v341_v8 }
 0x1eb   : > { %v645_v9 = vpop.eup %644 }
 0x1ec   : > { %v343_v10 = vsel %vm336_vm2, %v645_v9, 0.0 }
 0x1ed   : > { %344 = vadd.xlane.f32.xlu0 %v343_v10 }
 0x27a   : > { %v345_v12 = vpop.xlane.xlu0 %344 }
 0x27b   : > { %646 = vrcp.f32 %v345_v12 }
 0x285   : > { %v647_v13 = vpop.eup %646 }
 0x286   : > { %v347_v14 = vmul.f32 %v647_v13, %v645_v9 }
 0x288   : > { %584 = vmatmul.mubr.msk.f32.vlgmr.msra.gmra.mrb[0].mxu1 %vm336_vm2, %v347_v14 }
 0x35b   : > { %v418_v15 = vpop.f32.mrb[0].mxu1 }
 0x35c   : > { %423 = vst.msk [vmem:[%s256_s9] sm:$0xff] %vm422_vm3, %v418_v15  ;;  %v585_v16 = vpop.f32.mrb[1].mxu1 }
 0x35d   : > { %751 = shalt.err (!%p748_p8)
}
 0x35e   : > { %s752_s7 = scalar_lea.hbm %s1030_s29, 128  ;;  %s756_s1 = scalar_lea.hbm %s1077_s3, 256 }
 0x35f   : > { %p753_p13 = scmp.ne.s32.totalorder %s1030_s29, %s752_s7  ;;  %p757_p3 = scmp.lt.u32.totalorder %s1030_s29, %s1077_s3 }
 0x360   : > { %p758_p4 = scmp.lt.u32.totalorder %s756_s1, %s752_s7  ;;  %p760_p10 = scmp.lt.u32.totalorder %s752_s7, %s1030_s29 }
 0x361   : > { %p754_p11 = pnand %p753_p13, %p1095_p5 }
 0x362   : > { %p759_p2 = por %p758_p4, %p757_p3 }
 0x363   : > { %p755_p1 = pneg %p754_p11 }
 0x364   : > { %p761_p7 = por %p760_p10, %p759_p2 }
 0x366   : > { %p762_p9 = pnand %p761_p7, %p755_p1 }
 0x368   : > { %765 = shalt.err (!%p762_p9)
}
 0x369   : > { %592 = dma.vmem_to_hbm [thread:$0]  (%p1095_p5), %s1032_s25, 128, %s1030_s29, %s425_s5  }
 0x36a PF: > { %s450_s8 = sand.u32 1, %s796_s12   ;;  %p1096_p6 = scmp.ne.s32.totalorder %s1085_s24, 0 }
 0x36b   : > { %p1097_p12 = scmp.ge.s32.totalorder %s808_s15, 2  ;;  %s451_s20 = scalar_lea.sflag [#allocation4], %s450_s8 }
 0x36d   : > { %p605_p0 = pnand %p1097_p12, %p1096_p6 }
 0x36f   : > { %791 = dma.done.wait (!%p605_p0), %s451_s20, 128  }
 0x370   : > { %793 = vsyncadd (!%p605_p0), %s451_s20, 4294967168  ;;  %p19_p8 = scmp.ge.s32.totalorder %s861_s18, 4   ;;  %s1098_s12 = smov %s800_s13 }
 0x371   : > { %s1099_s13 = smov %s804_s14  ;;  %s1100_s14 = smov %s873_s21 }
 0x372   : > { %s1101_s15 = smov %s861_s18  ;;  %21 = sbr.rel (!%p19_p8) target bundleno = 9 (0x9), region = 101 }
 0x379   :  { %456 = vsyncpa [#allocation3], 1 }
 0x37a   :  { %458 = vsyncpa [#allocation3 + $0x1], 1 }
 0x37b   :  { %459 = vsyncpa [#allocation6], 1 }
 0x37c   :  { %461 = vsyncpa [#allocation6 + $0x1], 1 }
 0x37d   :  { %462 = vsyncpa [#allocation4], 1 }
 0x37e   :  { %464 = vsyncpa [#allocation4 + $0x1], 1 }

</bundles_post_ra>
